<compile_context>
chip_gen: v7x
topology: tpu7x:2x2x1
jax: 0.10.0
libtpu: 0.0.40
codegen_flags: <defaults>
</compile_context>

<pallas_src>
import functools

import jax
import jax.numpy as jnp
from jax.experimental import pallas as pl
from jax.experimental.pallas import tpu as pltpu

raw_text = ('We are about to study the idea of a computational process.\n'
            'Computational processes are abstract beings that inhabit computers.\n'
            'As they evolve, processes manipulate other abstract things called data.\n'
            'The evolution of a process is directed by a pattern of rules\n'
            'called a program. People create programs to direct processes. In effect,\n'
            'we conjure the spirits of the computer with our spells.').split()

vocab = sorted(set(raw_text))
VOCAB_SIZE = len(vocab)          # 49
EBD_SIZE = 16
CONT_SIZE = 2
HIDDEN = 128
N_CTX = 2 * CONT_SIZE            # 4 context words per example
D_IN = EBD_SIZE * N_CTX          # 64 (flattened embedding width)


def _round_up(x, m):
    return (x + m - 1) // m * m


def _use_bf16_exp():
    """bf16 EUP exists on v6e / v7x; on v5e and older keep the softmax in f32."""
    try:
        kind = jax.devices()[0].device_kind.lower()
    except Exception:
        return False
    return any(tag in kind for tag in ("v6", "v7", "7x"))


def cbow_kernel(idx_ref, w1e_ref, b1_ref, w2_ref, b2_ref, o_ref, *, exp_in_bf16):
    # idx : (tb, N_CTX)        int32  context word ids for this batch tile
    # w1e : (N_CTX*V_PAD, H)   bf16   embedding table folded into first linear
    # b1  : (1, H)             f32
    # w2  : (H, V_PAD)         bf16   second linear, vocab-padded columns
    # b2  : (1, V_PAD)         f32    padded lanes hold -1e30 (softmax mask)
    # o   : (tb, V_PAD)        f32    log-probabilities (padded lanes are junk)
    tb, n_ctx = idx_ref.shape
    k_dim = w1e_ref.shape[0]
    v_blk = k_dim // n_ctx                      # padded vocab (= 128)

    idx = idx_ref[...]                          # (tb, n_ctx)
    lane = jax.lax.broadcasted_iota(jnp.int32, (tb, k_dim), 1)

    # Single (tb, n_ctx*v_blk) one-hot: lane block c is hot at position idx[:, c].
    # Exact gather: 0/1 representable in bf16, accumulation in f32 on the MXU.
    hit = lane == idx[:, 0:1]
    for c in range(1, n_ctx):                   # static unroll (3 extra compares)
        hit = hit | (lane == (idx[:, c:c + 1] + c * v_blk))
    onehot = hit.astype(w1e_ref.dtype)          # (tb, k_dim) bf16

    # First layer: one K=512, N=128 matmul (embedding gather + flatten + Linear).
    h = jnp.dot(onehot, w1e_ref[...],
                preferred_element_type=jnp.float32) + b1_ref[...]
    h = jnp.maximum(h, 0.0)                     # ReLU, f32

    logits = jnp.dot(h.astype(w2_ref.dtype), w2_ref[...],
                     preferred_element_type=jnp.float32) + b2_ref[...]

    # Numerically-stable log_softmax; padded lanes carry -1e30 bias so they never
    # win the max and their exp underflows to 0 (in bf16 too).
    m = jnp.max(logits, axis=-1, keepdims=True)
    s = logits - m
    if exp_in_bf16:
        p = jnp.exp(s.astype(jnp.bfloat16)).astype(jnp.float32)
    else:
        p = jnp.exp(s)
    lse = jnp.log(jnp.sum(p, axis=-1, keepdims=True))
    o_ref[...] = s - lse


def cbow_forward(inputs, ebd_w, w1, b1, w2, b2, *, block_b=512):
    """Batched CBOW forward.

    inputs: (B, 2*CONT_SIZE) int32 context word ids (or a single (2*CONT_SIZE,)
    window, matching the PyTorch module's per-example forward).
    Returns (B, VOCAB_SIZE) (or (1, VOCAB_SIZE)) log-probabilities, f32.
    """
    single = (inputs.ndim == 1)
    if single:
        inputs = inputs[None, :]
    B, C = inputs.shape
    assert C == N_CTX

    v_pad = _round_up(VOCAB_SIZE, 128)          # 128
    k_dim = N_CTX * v_pad                       # 512

    # --- fold embedding into the first linear (f32 product, single bf16 cast) ---
    w1_blocks = []
    for c in range(N_CTX):
        blk = ebd_w.astype(jnp.float32) @ w1[c * EBD_SIZE:(c + 1) * EBD_SIZE, :]
        blk = jnp.zeros((v_pad, HIDDEN), jnp.float32).at[:VOCAB_SIZE, :].set(blk)
        w1_blocks.append(blk)
    w1_eff = jnp.concatenate(w1_blocks, axis=0).astype(jnp.bfloat16)  # (k_dim, H)

    b1_p = b1.reshape(1, HIDDEN).astype(jnp.float32)
    w2_p = jnp.zeros((HIDDEN, v_pad), jnp.bfloat16).at[:, :VOCAB_SIZE].set(
        w2.astype(jnp.bfloat16))
    b2_p = jnp.full((1, v_pad), -1e30, jnp.float32).at[:, :VOCAB_SIZE].set(
        b2.reshape(1, VOCAB_SIZE).astype(jnp.float32))

    # --- batch tiling: large tiles, 16-aligned; keep >= 2 grid steps when possible
    b16 = _round_up(B, 16)
    tb = min(block_b, b16)
    if b16 // tb < 2 and tb >= 32:
        tb = _round_up(tb // 2, 16)             # give v7x's 2nd TC something to do
    b_pad = _round_up(B, tb)
    idx = jnp.zeros((b_pad, C), jnp.int32).at[:B, :].set(inputs.astype(jnp.int32))

    grid = (b_pad // tb,)
    kernel = functools.partial(cbow_kernel, exp_in_bf16=_use_bf16_exp())

    cost = pl.CostEstimate(
        flops=2 * b_pad * (k_dim * HIDDEN + HIDDEN * v_pad),
        transcendentals=b_pad * v_pad,
        bytes_accessed=(b_pad * C * 4                         # idx
                        + (k_dim * HIDDEN + HIDDEN * v_pad) * 2   # bf16 weights
                        + (HIDDEN + v_pad) * 4                # biases
                        + b_pad * v_pad * 4))                 # output writeback

    out = pl.pallas_call(
        kernel,
        out_shape=jax.ShapeDtypeStruct((b_pad, v_pad), jnp.float32),
        grid=grid,
        in_specs=[
            pl.BlockSpec((tb, C), lambda i: (i, 0)),            # context ids (tiled)
            pl.BlockSpec((k_dim, HIDDEN), lambda i: (0, 0)),    # folded W1 (resident)
            pl.BlockSpec((1, HIDDEN), lambda i: (0, 0)),        # b1 (resident)
            pl.BlockSpec((HIDDEN, v_pad), lambda i: (0, 0)),    # w2 (resident)
            pl.BlockSpec((1, v_pad), lambda i: (0, 0)),         # b2 (+ softmax mask)
        ],
        out_specs=pl.BlockSpec((tb, v_pad), lambda i: (i, 0)),
        compiler_params=pltpu.CompilerParams(
            dimension_semantics=("parallel",)),                 # batch across TCs
        cost_estimate=cost,
    )(idx, w1_eff, b1_p, w2_p, b2_p)

    out = out[:B, :VOCAB_SIZE]
    return out[0:1] if single else out


def init_params(key):
    k_ebd, k_w1, k_w2 = jax.random.split(key, 3)
    scope = 0.1
    # Matches CBOW._init_weight exactly: ebd ~ U(-scope, scope),
    # lr1/lr2 weights ~ U(0, scope), biases = 0.
    ebd_w = jax.random.uniform(k_ebd, (VOCAB_SIZE, EBD_SIZE),
                               minval=-scope, maxval=scope, dtype=jnp.float32)
    # PyTorch Linear weight is (out, in); we store the transpose (in, out) for x @ W.
    w1 = jax.random.uniform(k_w1, (D_IN, HIDDEN),
                            minval=0.0, maxval=scope, dtype=jnp.float32)
    b1 = jnp.zeros((HIDDEN,), dtype=jnp.float32)
    w2 = jax.random.uniform(k_w2, (HIDDEN, VOCAB_SIZE),
                            minval=0.0, maxval=scope, dtype=jnp.float32)
    b2 = jnp.zeros((VOCAB_SIZE,), dtype=jnp.float32)
    return ebd_w, w1, b1, w2, b2


def _reference(inputs, ebd_w, w1, b1, w2, b2):
    x = jnp.take(ebd_w, inputs, axis=0).reshape(inputs.shape[0], -1)
    h = jnp.maximum(x @ w1 + b1, 0.0)
    return jax.nn.log_softmax(h @ w2 + b2, axis=-1)


if __name__ == "__main__":
    key = jax.random.PRNGKey(0)
    k_params, k_in_small, k_in_big = jax.random.split(key, 3)

    ebd_w, w1, b1, w2, b2 = init_params(k_params)

    # --- small batch (also the shape the PyTorch module processes one row at a time)
    B = 8
    inputs = jax.random.randint(k_in_small, (B, N_CTX), 0, VOCAB_SIZE,
                                dtype=jnp.int32)
    out = jax.block_until_ready(cbow_forward(inputs, ebd_w, w1, b1, w2, b2))

    assert out.shape == (B, VOCAB_SIZE)
    assert jnp.allclose(jnp.sum(jnp.exp(out), axis=-1), 1.0, atol=1e-3)
    ref = _reference(inputs, ebd_w, w1, b1, w2, b2)
    assert jnp.allclose(out, ref, atol=5e-2), float(jnp.max(jnp.abs(out - ref)))

    # --- single window, matching the module's forward(inputs).view(1, -1) path
    out1 = jax.block_until_ready(cbow_forward(inputs[0], ebd_w, w1, b1, w2, b2))
    assert out1.shape == (1, VOCAB_SIZE)
    assert jnp.allclose(out1, ref[0:1], atol=5e-2)

    # --- larger batch to exercise multi-tile grid (and TC sharding on v7x)
    Bb = 600
    inputs_b = jax.random.randint(k_in_big, (Bb, N_CTX), 0, VOCAB_SIZE,
                                  dtype=jnp.int32)
    out_b = jax.block_until_ready(cbow_forward(inputs_b, ebd_w, w1, b1, w2, b2))
    ref_b = _reference(inputs_b, ebd_w, w1, b1, w2, b2)
    assert out_b.shape == (Bb, VOCAB_SIZE)
    assert jnp.allclose(out_b, ref_b, atol=5e-2), \
        float(jnp.max(jnp.abs(out_b - ref_b)))

    print("KERNEL_OK")
</pallas_src>

<mosaic_0001>
module attributes {stable_mosaic.version = 11 : i64} {
  func.func @cbow_kernel(%arg0: i32, %arg1: memref<16x4xi32, #tpu.memory_space<vmem>>, %arg2: memref<512x128xbf16, #tpu.memory_space<vmem>>, %arg3: memref<1x128xf32, #tpu.memory_space<vmem>>, %arg4: memref<128x128xbf16, #tpu.memory_space<vmem>>, %arg5: memref<1x128xf32, #tpu.memory_space<vmem>>, %arg6: memref<16x128xf32, #tpu.memory_space<vmem>>) attributes {dimension_semantics = [#tpu.dimension_semantics<parallel>], iteration_bounds = array<i64: 1>, scalar_prefetch = 0 : i64, scratch_operands = 0 : i64, tpu.core_type = #tpu.core_type<tc>, window_params = [{transform_indices = @transform_0, window_bounds = array<i64: 16, 4>}, {pipeline_mode = #tpu.pipeline_mode<synchronous>, transform_indices = @transform_1, window_bounds = array<i64: 512, 128>}, {pipeline_mode = #tpu.pipeline_mode<synchronous>, transform_indices = @transform_2, window_bounds = array<i64: 1, 128>}, {pipeline_mode = #tpu.pipeline_mode<synchronous>, transform_indices = @transform_3, window_bounds = array<i64: 128, 128>}, {pipeline_mode = #tpu.pipeline_mode<synchronous>, transform_indices = @transform_4, window_bounds = array<i64: 1, 128>}, {transform_indices = @transform_5, window_bounds = array<i64: 16, 128>}]} {
    %c0 = arith.constant 0 : index
    %c0_0 = arith.constant 0 : index
    %0 = vector.load %arg1[%c0, %c0_0] : memref<16x4xi32, #tpu.memory_space<vmem>>, vector<16x4xi32>
    %1 = tpu.iota {dimensions = array<i32: 1>} : vector<16x512xi32>
    %2 = vector.extract_strided_slice %0 {offsets = [0, 0], sizes = [16, 1], strides = [1, 1]} : vector<16x4xi32> to vector<16x1xi32>
    %3 = vector.broadcast %2 : vector<16x1xi32> to vector<16x512xi32>
    %4 = arith.cmpi eq, %1, %3 : vector<16x512xi32>
    %5 = vector.extract_strided_slice %0 {offsets = [0, 1], sizes = [16, 1], strides = [1, 1]} : vector<16x4xi32> to vector<16x1xi32>
    %c128_i32 = arith.constant 128 : i32
    %6 = vector.broadcast %c128_i32 : i32 to vector<16x1xi32>
    %7 = arith.addi %5, %6 : vector<16x1xi32>
    %8 = vector.broadcast %7 : vector<16x1xi32> to vector<16x512xi32>
    %9 = arith.cmpi eq, %1, %8 : vector<16x512xi32>
    %10 = arith.ori %4, %9 : vector<16x512xi1>
    %11 = vector.extract_strided_slice %0 {offsets = [0, 2], sizes = [16, 1], strides = [1, 1]} : vector<16x4xi32> to vector<16x1xi32>
    %c256_i32 = arith.constant 256 : i32
    %12 = vector.broadcast %c256_i32 : i32 to vector<16x1xi32>
    %13 = arith.addi %11, %12 : vector<16x1xi32>
    %14 = vector.broadcast %13 : vector<16x1xi32> to vector<16x512xi32>
    %15 = arith.cmpi eq, %1, %14 : vector<16x512xi32>
    %16 = arith.ori %10, %15 : vector<16x512xi1>
    %17 = vector.extract_strided_slice %0 {offsets = [0, 3], sizes = [16, 1], strides = [1, 1]} : vector<16x4xi32> to vector<16x1xi32>
    %c384_i32 = arith.constant 384 : i32
    %18 = vector.broadcast %c384_i32 : i32 to vector<16x1xi32>
    %19 = arith.addi %17, %18 : vector<16x1xi32>
    %20 = vector.broadcast %19 : vector<16x1xi32> to vector<16x512xi32>
    %21 = arith.cmpi eq, %1, %20 : vector<16x512xi32>
    %22 = arith.ori %16, %21 : vector<16x512xi1>
    %23 = arith.extui %22 : vector<16x512xi1> to vector<16x512xi32>
    %24 = arith.sitofp %23 : vector<16x512xi32> to vector<16x512xf32>
    %25 = arith.truncf %24 : vector<16x512xf32> to vector<16x512xbf16>
    %c0_1 = arith.constant 0 : index
    %c0_2 = arith.constant 0 : index
    %26 = vector.load %arg2[%c0_1, %c0_2] : memref<512x128xbf16, #tpu.memory_space<vmem>>, vector<512x128xbf16>
    %cst = arith.constant dense<0.000000e+00> : vector<16x128xf32>
    %27 = tpu.matmul %25, %26, %cst {dimension_numbers = #tpu.dot_dimension_numbers<[1], [0], [0], [1], [0, 0, 1, 1], [], []>} : vector<16x512xbf16>, vector<512x128xbf16>, vector<16x128xf32> -> vector<16x128xf32>
    %c0_3 = arith.constant 0 : index
    %c0_4 = arith.constant 0 : index
    %28 = vector.load %arg3[%c0_3, %c0_4] : memref<1x128xf32, #tpu.memory_space<vmem>>, vector<1x128xf32>
    %29 = vector.broadcast %28 : vector<1x128xf32> to vector<16x128xf32>
    %30 = arith.addf %27, %29 : vector<16x128xf32>
    %cst_5 = arith.constant 0.000000e+00 : f32
    %31 = vector.broadcast %cst_5 : f32 to vector<16x128xf32>
    %32 = arith.maximumf %30, %31 : vector<16x128xf32>
    %33 = arith.truncf %32 : vector<16x128xf32> to vector<16x128xbf16>
    %c0_6 = arith.constant 0 : index
    %c0_7 = arith.constant 0 : index
    %34 = vector.load %arg4[%c0_6, %c0_7] : memref<128x128xbf16, #tpu.memory_space<vmem>>, vector<128x128xbf16>
    %cst_8 = arith.constant dense<0.000000e+00> : vector<16x128xf32>
    %35 = tpu.matmul %33, %34, %cst_8 {dimension_numbers = #tpu.dot_dimension_numbers<[1], [0], [0], [1], [0, 0, 1, 1], [], []>} : vector<16x128xbf16>, vector<128x128xbf16>, vector<16x128xf32> -> vector<16x128xf32>
    %c0_9 = arith.constant 0 : index
    %c0_10 = arith.constant 0 : index
    %36 = vector.load %arg5[%c0_9, %c0_10] : memref<1x128xf32, #tpu.memory_space<vmem>>, vector<1x128xf32>
    %37 = vector.broadcast %36 : vector<1x128xf32> to vector<16x128xf32>
    %38 = arith.addf %35, %37 : vector<16x128xf32>
    %cst_11 = arith.constant dense<0xFF800000> : vector<16xf32>
    %39 = vector.multi_reduction <maximumf>, %38, %cst_11 [1] : vector<16x128xf32> to vector<16xf32>
    %40 = vector.shape_cast %39 : vector<16xf32> to vector<16x1xf32>
    %41 = vector.broadcast %40 : vector<16x1xf32> to vector<16x128xf32>
    %42 = arith.subf %38, %41 : vector<16x128xf32>
    %43 = math.exp %42 : vector<16x128xf32>
    %cst_12 = arith.constant dense<0.000000e+00> : vector<16xf32>
    %44 = vector.multi_reduction <add>, %43, %cst_12 [1] : vector<16x128xf32> to vector<16xf32>
    %45 = vector.shape_cast %44 : vector<16xf32> to vector<16x1xf32>
    %46 = math.log %45 : vector<16x1xf32>
    %47 = vector.broadcast %46 : vector<16x1xf32> to vector<16x128xf32>
    %48 = arith.subf %42, %47 : vector<16x128xf32>
    %c0_13 = arith.constant 0 : index
    %c0_14 = arith.constant 0 : index
    %49 = vector.load %arg6[%c0_13, %c0_14] : memref<16x128xf32, #tpu.memory_space<vmem>>, vector<16x128xf32>
    tpu.vector_store %arg6[%c0_13, %c0_14], %48 {strides = array<i32>} : memref<16x128xf32, #tpu.memory_space<vmem>>, vector<16x128xf32>,
    return
  }
  func.func @transform_0(%arg0: i32) -> (i32, i32) {
    %c0_i32 = arith.constant 0 : i32
    %c0_i32_0 = arith.constant 0 : i32
    return %arg0, %c0_i32 : i32, i32
  }
  func.func @transform_1(%arg0: i32) -> (i32, i32) {
    %c0_i32 = arith.constant 0 : i32
    %c0_i32_0 = arith.constant 0 : i32
    %c0_i32_1 = arith.constant 0 : i32
    return %c0_i32, %c0_i32_0 : i32, i32
  }
  func.func @transform_2(%arg0: i32) -> (i32, i32) {
    %c0_i32 = arith.constant 0 : i32
    %c0_i32_0 = arith.constant 0 : i32
    %c0_i32_1 = arith.constant 0 : i32
    return %c0_i32, %c0_i32_0 : i32, i32
  }
  func.func @transform_3(%arg0: i32) -> (i32, i32) {
    %c0_i32 = arith.constant 0 : i32
    %c0_i32_0 = arith.constant 0 : i32
    %c0_i32_1 = arith.constant 0 : i32
    return %c0_i32, %c0_i32_0 : i32, i32
  }
  func.func @transform_4(%arg0: i32) -> (i32, i32) {
    %c0_i32 = arith.constant 0 : i32
    %c0_i32_0 = arith.constant 0 : i32
    %c0_i32_1 = arith.constant 0 : i32
    return %c0_i32, %c0_i32_0 : i32, i32
  }
  func.func @transform_5(%arg0: i32) -> (i32, i32) {
    %c0_i32 = arith.constant 0 : i32
    %c0_i32_0 = arith.constant 0 : i32
    return %arg0, %c0_i32 : i32, i32
  }
}

</mosaic_0001>

<bundles_post_ra>
// kernel: tpu_custom_call.1
= control target key start
LH: loop header
LB: loop body
LE: loop exit
PB: predicated region body
PF: predicated region fallthrough
CT: control target
= control target key end

     0   :  { %10 = vsyncpa [#allocation3], 0  ;;  %s1096_s0 = inlined_call_operand.vmem [shape: s32[16,4], index: 0, kind: input, shape index: {}]   ;;  %s1097_s1 = inlined_call_operand.hbm [shape: bf16[512,128], index: 1, kind: input, shape index: {}]   ;;  %s1098_s2 = inlined_call_operand.vmem [shape: f32[1,128], index: 2, kind: input, shape index: {}]   ;;  %s1099_s3 = inlined_call_operand.hbm [shape: bf16[128,128], index: 3, kind: input, shape index: {}]   ;;  %s1100_s4 = inlined_call_operand.vmem [shape: f32[1,128], index: 4, kind: input, shape index: {}]   ;;  %s1101_s5 = inlined_call_operand.hbm [shape: f32[16,128], index: 5, kind: output, shape index: {}]  }
   0x1   :  { %11 = vsyncpa [#allocation6], 0 }
   0x2   :  { %12 = vsyncpa [#allocation4], 0  ;;  %s934_s18 = smov [#allocation2]   ;;  %s862_s22 = scalar_lea.hbm %s1097_s1, 4096 }
   0x3   :  { %s20_s19 = sshll.u32 %s934_s18, 4  ;;  %p863_p0 = scmp.ne.s32.totalorder %s1097_s1, %s862_s22  ;;  %s21_s19 = int_to_ptr.vmem [resolvable:$true] %s20_s19 }
   0x4   :  { %p866_p1 = scmp.lt.u32.totalorder %s862_s22, %s1097_s1 }
   0x6   :  { %p868_p2 = pnand %p866_p1, %p863_p0 }
   0x8   :  { %871 = shalt.err (!%p868_p2)
}
   0x9   :  { %s872_s27 = scalar_lea.vmem %s21_s19, 4096  ;;  %p877_p4 = scmp.lt.s32.totalorder %s21_s19, %s21_s19 }
   0xa   :  { %p873_p3 = scmp.ne.s32.totalorder %s21_s19, %s872_s27  ;;  %p878_p5 = scmp.lt.s32.totalorder %s872_s27, %s872_s27 }
   0xc   :  { %p879_p6 = por %p878_p5, %p877_p4 }
   0xe   :  { %p880_p7 = pnand %p879_p6, %p873_p3 }
  0x10   :  { %883 = shalt.err (!%p880_p7)
}
  0x11   :  { %s935_s28 = smov 64   ;;  %s936_s29 = smov 4  }
  0x12   :  { %26 = dma.hbm_to_vmem [thread:$0]  %s1097_s1, 4096, %s21_s19, [#allocation3], %s935_s28, %s935_s28, %s936_s29  }
  0x13   :  { %s937_s7 = smov [#allocation5]   ;;  %s884_s11 = scalar_lea.hbm %s1099_s3, 1024 }
  0x14   :  { %s34_s8 = sshll.u32 %s937_s7, 4  ;;  %p885_p8 = scmp.ne.s32.totalorder %s1099_s3, %s884_s11  ;;  %s35_s8 = int_to_ptr.vmem [resolvable:$true] %s34_s8 }
  0x15   :  { %p888_p9 = scmp.lt.u32.totalorder %s884_s11, %s1099_s3 }
  0x17   :  { %p890_p10 = pnand %p888_p9, %p885_p8 }
  0x19   :  { %893 = shalt.err (!%p890_p10)
}
  0x1a   :  { %s894_s16 = scalar_lea.vmem %s35_s8, 1024  ;;  %p899_p12 = scmp.lt.s32.totalorder %s35_s8, %s35_s8 }
  0x1b   :  { %p895_p11 = scmp.ne.s32.totalorder %s35_s8, %s894_s16  ;;  %p900_p13 = scmp.lt.s32.totalorder %s894_s16, %s894_s16 }
  0x1d   :  { %p901_p0 = por %p900_p13, %p899_p12 }
  0x1f   :  { %p902_p1 = pnand %p901_p0, %p895_p11 }
  0x21   :  { %905 = shalt.err (!%p902_p1)
}
  0x22   :  { %40 = dma.hbm_to_vmem [thread:$0]  %s1099_s3, 1024, %s35_s8, [#allocation6], %s935_s28, %s935_s28, %s936_s29  }
  0x23   :  { %928 = dma.done.wait [#allocation3], 4096  }
  0x24   :  { %929 = vsyncadd [#allocation3], 4294963200 }
  0x25   :  { %930 = dma.done.wait [#allocation6], 1024  }
  0x26   :  { %931 = vsyncadd [#allocation6], 4294966272  ;;  %v938_v0 = vmov 0   ;;  %v939_v1 = vmov 1   ;;  %v50_v2 = vld [vmem:[%s1096_s0] sm:$0xff]  ;;  %v51_v3 = vld [vmem:[%s1096_s0 + $0x8] sm:$0xff]  ;;  %v52_v45 = vlaneseq }
  0x27   :  { %808 = vset.pattern.permute.xlu0 %v938_v0  ;;  %809 = vset.pattern.permute.xlu1 %v939_v1  ;;  %v71_v4 = vadd.s32 128, %v50_v2  ;;  %v72_v5 = vadd.s32 128, %v51_v3  ;;  %v814_v6 = vld [vmem:[#allocation2 + $0x40] sm:$0xff]   ;;  %v95_v10 = vadd.s32 256, %v50_v2  ;;  %v818_v11 = vld [vmem:[#allocation2 + $0x48] sm:$0xff]   ;;  %v96_v13 = vadd.s32 256, %v51_v3 }
  0x28   :  { %58 = vperm.xlu0 %808, %v50_v2   ;;  %v815_v7 = vld [vmem:[#allocation2 + $0xc0] sm:$0xff]   ;;  %721 = vmatprep.subr.bf16.mxu0 %v814_v6  ;;  %v819_v12 = vld [vmem:[#allocation2 + $0xc8] sm:$0xff]   ;;  %v940_v15 = vmov 2   ;;  %v822_v17 = vld [vmem:[#allocation2 + $0x50] sm:$0xff]   ;;  %v120_v18 = vadd.s32 384, %v51_v3  ;;  %v119_v21 = vadd.s32 384, %v50_v2 }
  0x29   :  { %74 = vperm.xlu1 %809, %v71_v4   ;;  %743 = vmatprep.subr.bf16.mxu1 %v815_v7  ;;  %v816_v8 = vld [vmem:[#allocation2] sm:$0xff]   ;;  %v820_v14 = vld [vmem:[#allocation2 + $0x8] sm:$0xff]   ;;  %v823_v19 = vld [vmem:[#allocation2 + $0xd0] sm:$0xff]   ;;  %v941_v23 = vmov 3   ;;  %v942_v44 = vmov 0.0   ;;  %v1009_v46 = vand.u32 127, %v52_v45 }
  0x2a   :  { %v817_v9 = vld [vmem:[#allocation2 + $0x80] sm:$0xff]   ;;  %722 = vmatpush3.bf16.msra.mxu0 %v816_v8  ;;  %v821_v16 = vld [vmem:[#allocation2 + $0x88] sm:$0xff]   ;;  %v824_v20 = vld [vmem:[#allocation2 + $0x10] sm:$0xff]   ;;  %v1106_v55 = vmov 0  ;;  %v1108_v59 = vmov 0  ;;  %v1110_v60 = vmov 0 }
  0x2b   :  { %744 = vmatpush3.bf16.msra.mxu1 %v817_v9  ;;  %723 = vmatprep.subr.bf16.mxu0 %v818_v11  ;;  %v825_v22 = vld [vmem:[#allocation2 + $0x90] sm:$0xff]   ;;  %v826_v24 = vld [vmem:[#allocation2 + $0x58] sm:$0xff]   ;;  %v830_v28 = vld [vmem:[#allocation2 + $0x60] sm:$0xff]   ;;  %v54_v47 = vadd.s32 128, %v1009_v46  ;;  %v56_v49 = vadd.s32 384, %v1009_v46  ;;  %v55_v57 = vadd.s32 256, %v1009_v46 }
  0x2c   :  { %61 = vperm.xlu0 %808, %v51_v3   ;;  %745 = vmatprep.subr.bf16.mxu1 %v819_v12  ;;  %v827_v25 = vld [vmem:[#allocation2 + $0xd8] sm:$0xff]   ;;  %v831_v29 = vld [vmem:[#allocation2 + $0xe0] sm:$0xff]   ;;  %v834_v32 = vld [vmem:[#allocation2 + $0x68] sm:$0xff]   ;;  %v1112_v61 = vmov 0  ;;  %v1115_v63 = vmov 0  ;;  %v1118_v1 = vmov 0 }
  0x2d   :  { %77 = vperm.xlu1 %809, %v72_v5   ;;  %v828_v26 = vld [vmem:[#allocation2 + $0x18] sm:$0xff]   ;;  %v832_v30 = vld [vmem:[#allocation2 + $0x20] sm:$0xff]   ;;  %v835_v33 = vld [vmem:[#allocation2 + $0xe8] sm:$0xff]   ;;  %v943_v2 = vmov 1.0|1.0  }
  0x2e   :  { %724 = vmatpush3.bf16.msra.mxu0 %v820_v14  ;;  %v829_v27 = vld [vmem:[#allocation2 + $0x98] sm:$0xff]   ;;  %v833_v31 = vld [vmem:[#allocation2 + $0xa0] sm:$0xff]   ;;  %v836_v34 = vld [vmem:[#allocation2 + $0x28] sm:$0xff]  }
  0x2f   :  { %746 = vmatpush3.bf16.msra.mxu1 %v821_v16  ;;  %725 = vmatprep.subr.bf16.mxu0 %v822_v17  ;;  %v837_v35 = vld [vmem:[#allocation2 + $0xa8] sm:$0xff]   ;;  %v838_v36 = vld [vmem:[#allocation2 + $0x70] sm:$0xff]   ;;  %v842_v40 = vld [vmem:[#allocation2 + $0x78] sm:$0xff]  }
  0x30   :  { %810 = vset.pattern.permute.xlu0 %v940_v15  ;;  %747 = vmatprep.subr.bf16.mxu1 %v823_v19  ;;  %v839_v37 = vld [vmem:[#allocation2 + $0xf0] sm:$0xff]   ;;  %v843_v41 = vld [vmem:[#allocation2 + $0xf8] sm:$0xff]   ;;  %v846_v3 = vld [vmem:[#allocation5] sm:$0xff]  }
  0x31   :  { %98 = vperm.xlu0 %810, %v95_v10   ;;  %811 = vset.pattern.permute.xlu1 %v940_v15  ;;  %v840_v38 = vld [vmem:[#allocation2 + $0x30] sm:$0xff]   ;;  %v844_v42 = vld [vmem:[#allocation2 + $0x38] sm:$0xff]   ;;  %v847_v4 = vld [vmem:[#allocation5 + $0x8] sm:$0xff]  }
  0x32   :  { %101 = vperm.xlu1 %811, %v96_v13   ;;  %726 = vmatpush3.bf16.msra.mxu0 %v824_v20  ;;  %v841_v39 = vld [vmem:[#allocation2 + $0xb0] sm:$0xff]   ;;  %v845_v43 = vld [vmem:[#allocation2 + $0xb8] sm:$0xff]   ;;  %v850_v7 = vld [vmem:[#allocation5 + $0x20] sm:$0xff]  }
  0x33   :  { %748 = vmatpush3.bf16.msra.mxu1 %v825_v22  ;;  %727 = vmatprep.subr.bf16.mxu0 %v826_v24  ;;  %v848_v5 = vld [vmem:[#allocation5 + $0x10] sm:$0xff]   ;;  %v849_v6 = vld [vmem:[#allocation5 + $0x18] sm:$0xff]   ;;  %v851_v8 = vld [vmem:[#allocation5 + $0x28] sm:$0xff]  }
  0x34   :  { %749 = vmatprep.subr.bf16.mxu1 %v827_v25  ;;  %v852_v9 = vld [vmem:[#allocation5 + $0x30] sm:$0xff]   ;;  %v853_v10 = vld [vmem:[#allocation5 + $0x38] sm:$0xff]   ;;  %v671_v15 = vld [vmem:[%s1098_s2] ss:$0 sm:$0xff]  ;;  %s945_s2 = smov [#allocation7]  }
  0x35   :  { %813 = vset.pattern.permute.xlu0 %v941_v23 }
  0x36   :  { %125 = vperm.xlu0 %813, %v120_v18   ;;  %812 = vset.pattern.permute.xlu1 %v941_v23 }
  0x37   :  { %122 = vperm.xlu1 %812, %v119_v21   ;;  %728 = vmatpush3.bf16.msra.mxu0 %v828_v26 }
  0x38   :  { %750 = vmatpush3.bf16.msra.mxu1 %v829_v27  ;;  %729 = vmatprep.subr.bf16.mxu0 %v830_v28 }
  0x39   :  { %751 = vmatprep.subr.bf16.mxu1 %v831_v29 }
  0x3b   :  { %730 = vmatpush3.bf16.msra.mxu0 %v832_v30 }
  0x3c   :  { %752 = vmatpush3.bf16.msra.mxu1 %v833_v31  ;;  %731 = vmatprep.subr.bf16.mxu0 %v834_v32  ;;  %v712_v31 = vld [vmem:[%s1100_s4] ss:$0 sm:$0xff]  ;;  %s650_s4 = sshll.u32 %s945_s2, 4  ;;  %s651_s4 = int_to_ptr.vmem [resolvable:$true] %s650_s4 }
  0x3d   :  { %753 = vmatprep.subr.bf16.mxu1 %v835_v33  ;;  %s906_s24 = scalar_lea.vmem %s651_s4, 256  ;;  %p911_p3 = scmp.lt.s32.totalorder %s651_s4, %s651_s4 }
  0x3e   :  { %p907_p2 = scmp.ne.s32.totalorder %s651_s4, %s906_s24  ;;  %p912_p4 = scmp.lt.s32.totalorder %s906_s24, %s906_s24 }
  0x3f   :  { %732 = vmatpush3.bf16.msra.mxu0 %v836_v34 }
  0x40   :  { %754 = vmatpush3.bf16.msra.mxu1 %v837_v35  ;;  %733 = vmatprep.subr.bf16.mxu0 %v838_v36  ;;  %p913_p5 = por %p912_p4, %p911_p3 }
  0x41   :  { %755 = vmatprep.subr.bf16.mxu1 %v839_v37 }
  0x42   :  { %p914_p6 = pnand %p913_p5, %p907_p2 }
  0x43   :  { %734 = vmatpush3.bf16.msra.mxu0 %v840_v38 }
  0x44   :  { %756 = vmatpush3.bf16.msra.mxu1 %v841_v39  ;;  %735 = vmatprep.subr.bf16.mxu0 %v842_v40 }
  0x45   :  { %757 = vmatprep.subr.bf16.mxu1 %v843_v41 }
  0x47   :  { %736 = vmatpush3.bf16.msra.mxu0 %v844_v42 }
  0x48   :  { %758 = vmatpush3.bf16.msra.mxu1 %v845_v43  ;;  %774 = vmatprep.subr.bf16.mxu0 %v942_v44 }
  0xa7   :  { %v59_v48 = vpop.permute.xlu0 %58 }
  0xa8   :  { %v75_v50 = vpop.permute.xlu1 %74  ;;  %vm64_vm0 = vcmp.eq.s32.totalorder %v54_v47, %v59_v48  ;;  %vm66_vm2 = vcmp.eq.s32.totalorder %v56_v49, %v59_v48  ;;  %vm63_vm4 = vcmp.eq.s32.totalorder %v1009_v46, %v59_v48 }
  0xa9   :  { %vm80_vm1 = vcmp.eq.s32.totalorder %v54_v47, %v75_v50  ;;  %vm82_vm3 = vcmp.eq.s32.totalorder %v56_v49, %v75_v50  ;;  %vm79_vm5 = vcmp.eq.s32.totalorder %v1009_v46, %v75_v50 }
  0xaa   :  { %vm1015_vm6 = vmor %vm64_vm0, %vm80_vm1 }
  0xab   :  { %v62_v51 = vpop.permute.xlu0 %61  ;;  %vm1019_vm9 = vmor %vm66_vm2, %vm82_vm3 }
  0xac   :  { %v78_v52 = vpop.permute.xlu1 %77  ;;  %vm68_vm10 = vcmp.eq.s32.totalorder %v54_v47, %v62_v51  ;;  %vm1023_vm11 = vmor %vm63_vm4, %vm79_vm5  ;;  %vm70_vm13 = vcmp.eq.s32.totalorder %v56_v49, %v62_v51  ;;  %vm67_vm3 = vcmp.eq.s32.totalorder %v1009_v46, %v62_v51 }
  0xad   :  { %vm84_vm7 = vcmp.eq.s32.totalorder %v54_v47, %v78_v52  ;;  %vm86_vm8 = vcmp.eq.s32.totalorder %v56_v49, %v78_v52  ;;  %v1107_v55 = vsel %vm1023_vm11, 4294967295, %v1106_v55  ;;  %vm83_vm14 = vcmp.eq.s32.totalorder %v1009_v46, %v78_v52 }
  0xae   :  { %vm92_vm12 = vmor %vm68_vm10, %vm84_vm7 }
  0xaf   :  { %vm94_vm0 = vmor %vm70_vm13, %vm86_vm8 }
  0xb0   :  { %v99_v56 = vpop.permute.xlu0 %98  ;;  %vm1043_vm13 = vmor %vm67_vm3, %vm83_vm14 }
  0xb1   :  { %vm104_vm15 = vcmp.eq.s32.totalorder %v54_v47, %v99_v56  ;;  %vm106_vm1 = vcmp.eq.s32.totalorder %v56_v49, %v99_v56  ;;  %v102_v58 = vpop.permute.xlu1 %101  ;;  %vm103_vm4 = vcmp.eq.s32.totalorder %v1009_v46, %v99_v56  ;;  %v1113_v61 = vsel %vm1043_vm13, 4294967295, %v1112_v61 }
  0xb2   :  { %vm1031_vm2 = vmor %vm1015_vm6, %vm104_vm15  ;;  %vm108_vm5 = vcmp.eq.s32.totalorder %v54_v47, %v102_v58  ;;  %vm110_vm7 = vcmp.eq.s32.totalorder %v56_v49, %v102_v58  ;;  %vm65_vm15 = vcmp.eq.s32.totalorder %v55_v57, %v59_v48 }
  0xb3   :  { %v1109_v59 = vsel %vm1031_vm2, 4294967295, %v1108_v59  ;;  %vm1039_vm10 = vmor %vm1019_vm9, %vm106_vm1  ;;  %vm81_vm2 = vcmp.eq.s32.totalorder %v55_v57, %v75_v50  ;;  %vm1114_vm9 = vnez %v1107_v55 }
  0xb4   :  { %v1111_v60 = vsel %vm1039_vm10, 4294967295, %v1110_v60  ;;  %vm116_vm8 = vmor %vm92_vm12, %vm108_vm5  ;;  %vm1117_vm13 = vnez %v1109_v59 }
  0xb5   :  { %v126_v62 = vpop.permute.xlu0 %125  ;;  %vm118_vm6 = vmor %vm94_vm0, %vm110_vm7 }
  0xb6   :  { %vm132_vm11 = vcmp.eq.s32.totalorder %v54_v47, %v126_v62  ;;  %vm134_vm1 = vcmp.eq.s32.totalorder %v56_v49, %v126_v62  ;;  %vm1049_vm10 = vmor %vm1114_vm9, %vm103_vm4  ;;  %v123_v0 = vpop.permute.xlu1 %122  ;;  %vm107_vm4 = vcmp.eq.s32.totalorder %v1009_v46, %v102_v58 }
  0xb7   :  { %v1116_v63 = vsel %vm1049_vm10, 4294967295, %v1115_v63  ;;  %vm140_vm5 = vmor %vm116_vm8, %vm132_vm11  ;;  %vm128_vm12 = vcmp.eq.s32.totalorder %v54_v47, %v123_v0  ;;  %vm130_vm3 = vcmp.eq.s32.totalorder %v56_v49, %v123_v0  ;;  %vm1120_vm10 = vnez %v1111_v60 }
  0xb8   :  { %vm142_vm14 = vmor %vm118_vm6, %vm134_vm1  ;;  %vm127_vm11 = vcmp.eq.s32.totalorder %v1009_v46, %v123_v0  ;;  %vm131_vm6 = vcmp.eq.s32.totalorder %v1009_v46, %v126_v62 }
  0xb9   :  { %vm136_vm0 = vmor %vm1117_vm13, %vm128_vm12  ;;  %vm1121_vm13 = vnez %v1113_v61  ;;  %vm1122_vm12 = vnez %v1116_v63 }
  0xba   :  { %vm1055_vm7 = vmor %vm65_vm15, %vm81_vm2  ;;  %vm85_vm15 = vcmp.eq.s32.totalorder %v55_v57, %v78_v52 }
  0xbb   :  { %v1119_v1 = vsel %vm1055_vm7, 4294967295, %v1118_v1  ;;  %vm704_vm9 = vmpackc.low %vm140_vm5, %vm136_vm0  ;;  %vm105_vm5 = vcmp.eq.s32.totalorder %v55_v57, %v99_v56 }
  0xbc   :  { %705 = vmatprep.mubr.msk.bf16.mxu0 %vm704_vm9, %v943_v2  ;;  %vm138_vm8 = vmor %vm1120_vm10, %vm130_vm3  ;;  %vm69_vm9 = vcmp.eq.s32.totalorder %v55_v57, %v62_v51  ;;  %vm109_vm3 = vcmp.eq.s32.totalorder %v55_v57, %v102_v58 }
  0xbd   :  { %vm708_vm1 = vmpackc.low %vm142_vm14, %vm138_vm8  ;;  %vm129_vm14 = vcmp.eq.s32.totalorder %v55_v57, %v123_v0 }
  0xbe   :  { %709 = vmatprep.mubr.msk.bf16.mxu1 %vm708_vm1, %v943_v2  ;;  %vm115_vm2 = vmor %vm1121_vm13, %vm107_vm4  ;;  %vm1123_vm1 = vnez %v1119_v1  ;;  %vm133_vm13 = vcmp.eq.s32.totalorder %v55_v57, %v126_v62 }
  0xbf   :  { %vm135_vm7 = vmor %vm1122_vm12, %vm127_vm11 }
  0xc0   :  { %vm139_vm0 = vmor %vm115_vm2, %vm131_vm6 }
  0xc1   :  { %vm706_vm10 = vmpackc.low %vm139_vm0, %vm135_vm7  ;;  %vm944_vm7 = vmmov 0  }
  0xc2   :  { %707 = vmatmul.mubr.msk.bf16.vlgmr.msra.gmra.mrb[0].mxu0 %vm706_vm10, %v943_v2  ;;  %vm93_vm8 = vmor %vm69_vm9, %vm85_vm15 }
  0xc3   :  { %vm113_vm4 = vmor %vm1123_vm1, %vm105_vm5  ;;  %775 = vmatpush3.bf16.msra.mxu0 %v846_v3  ;;  %790 = vmatprep.mubr.msk.bf16.mxu0 %vm944_vm7, %v942_v44 }
  0xc4   :  { %vm117_vm11 = vmor %vm93_vm8, %vm109_vm3  ;;  %776 = vmatprep.subr.bf16.mxu0 %v942_v44 }
  0xc5   :  { %vm137_vm12 = vmor %vm113_vm4, %vm129_vm14 }
  0xc6   :  { %vm141_vm2 = vmor %vm117_vm11, %vm133_vm13 }
  0xc7   :  { %vm710_vm6 = vmpackc.low %vm141_vm2, %vm137_vm12  ;;  %777 = vmatpush3.bf16.msra.mxu0 %v847_v4 }
  0xc8   :  { %711 = vmatmul.mubr.msk.bf16.vlgmr.msra.gmra.mrb[0].mxu1 %vm710_vm6, %v943_v2  ;;  %778 = vmatprep.subr.bf16.mxu0 %v942_v44 }
  0xcb   :  { %779 = vmatpush3.bf16.msra.mxu0 %v848_v5 }
  0xcc   :  { %780 = vmatprep.subr.bf16.mxu0 %v942_v44 }
  0xcf   :  { %781 = vmatpush3.bf16.msra.mxu0 %v849_v6 }
  0xd0   :  { %782 = vmatprep.subr.bf16.mxu0 %v942_v44 }
  0xd3   :  { %783 = vmatpush3.bf16.msra.mxu0 %v850_v7 }
  0xd4   :  { %784 = vmatprep.subr.bf16.mxu0 %v942_v44 }
  0xd7   :  { %785 = vmatpush3.bf16.msra.mxu0 %v851_v8 }
  0xd8   :  { %786 = vmatprep.subr.bf16.mxu0 %v942_v44 }
  0xdb   :  { %787 = vmatpush3.bf16.msra.mxu0 %v852_v9 }
  0xdc   :  { %788 = vmatprep.subr.bf16.mxu0 %v942_v44 }
  0xdf   :  { %789 = vmatpush3.bf16.msra.mxu0 %v853_v10 }
 0x195   :  { %v737_v11 = vpop.f32.mrb[0].mxu0 }
 0x196   :  { %v738_v12 = vpop.f32.mrb[1].mxu0 }
 0x197   :  { %v739_v13 = vadd.f32 %v738_v12, %v737_v11  ;;  %v740_v14 = vpop.f32.mrb[2].mxu0 }
 0x198   :  { %v741_v16 = vpop.f32.mrb[3].mxu0 }
 0x199   :  { %v742_v17 = vadd.f32 %v741_v16, %v740_v14  ;;  %v461_v19 = vadd.f32 %v739_v13, %v671_v15 }
 0x19b   :  { %v759_v18 = vpop.f32.mrb[0].mxu1  ;;  %v464_v23 = vadd.f32 %v742_v17, %v671_v15 }
 0x19c   :  { %v760_v20 = vpop.f32.mrb[1].mxu1 }
 0x19d   :  { %v761_v21 = vadd.f32 %v760_v20, %v759_v18  ;;  %v762_v22 = vpop.f32.mrb[2].mxu1 }
 0x19e   :  { %v763_v24 = vpop.f32.mrb[3].mxu1 }
 0x19f   :  { %v502_v25 = vadd.f32 %v761_v21, %v461_v19  ;;  %v764_v26 = vadd.f32 %v763_v24, %v762_v22 }
 0x1a1   :  { %v505_v27 = vadd.f32 %v764_v26, %v464_v23  ;;  %v508_v28 = vmax.f32 %v502_v25, 0.0 }
 0x1a3   :  { %v509_v29 = vmax.f32 %v505_v27, 0.0 }
 0x1a5   :  { %v510_v30 = vpack.c.bf16 %v509_v29, %v508_v28 }
 0x1a7   :  { %791 = vmatmul.mubr.bf16.vlgmr.msra.gmra.mrb[4].mxu0 %v510_v30 }
 0x27a   :  { %v616_v32 = vpop.f32.mrb[4].mxu0 }
 0x27b   :  { %v617_v33 = vadd.f32 %v712_v31, %v616_v32  ;;  %v792_v34 = vpop.f32.mrb[5].mxu0 }
 0x27c   :  { %v619_v35 = vpop.f32.mrb[6].mxu0 }
 0x27d   :  { %v620_v36 = vadd.f32 %v712_v31, %v619_v35  ;;  %623 = vmax.xlane.f32.xlu1 %v617_v33  ;;  %v793_v37 = vpop.f32.mrb[7].mxu0 }
 0x27f   :  { %625 = vmax.xlane.f32.xlu0 %v620_v36 }
 0x30a   :  { %v624_v38 = vpop.xlane.xlu1 %623 }
 0x30b   :  { %v627_v39 = vsub.f32 %v617_v33, %v624_v38 }
 0x30c   :  { %v626_v40 = vpop.xlane.xlu0 %625 }
 0x30d   :  { %v629_v41 = vmul.f32 1.442695, %v627_v39  ;;  %v628_v42 = vsub.f32 %v620_v36, %v626_v40 }
 0x30f   :  { %854 = vpow2.f32 %v629_v41  ;;  %v631_v43 = vmul.f32 1.442695, %v628_v42 }
 0x311   :  { %856 = vpow2.f32 %v631_v43 }
 0x319   :  { %v855_v44 = vpop.eup %854 }
 0x31a   :  { %633 = vadd.xlane.f32.xlu1 %v855_v44 }
 0x31b   :  { %v857_v45 = vpop.eup %856 }
 0x31c   :  { %635 = vadd.xlane.f32.xlu0 %v857_v45 }
 0x3a7   :  { %v634_v46 = vpop.xlane.xlu1 %633 }
 0x3a8   :  { %858 = vlog2.f32 %v634_v46 }
 0x3a9   :  { %v636_v47 = vpop.xlane.xlu0 %635 }
 0x3aa   :  { %860 = vlog2.f32 %v636_v47 }
 0x3b2   :  { %v859_v48 = vpop.eup %858 }
 0x3b3   :  { %v638_v49 = vmul.f32 0.6931472, %v859_v48 }
 0x3b4   :  { %v861_v50 = vpop.eup %860 }
 0x3b5   :  { %v641_v51 = vsub.f32 %v627_v39, %v638_v49  ;;  %v640_v52 = vmul.f32 0.6931472, %v861_v50 }
 0x3b7   :  { %643 = vst [vmem:[#allocation7] sm:$0xff] %v641_v51  ;;  %v642_v53 = vsub.f32 %v628_v42, %v640_v52 }
 0x3b9   :  { %644 = vst [vmem:[#allocation7 + $0x8] sm:$0xff] %v642_v53 }
 0x3ba   :  { %917 = shalt.err (!%p914_p6)
}
 0x3bb   :  { %s918_s27 = scalar_lea.hbm %s1101_s5, 256 }
 0x3bc   :  { %p919_p7 = scmp.ne.s32.totalorder %s1101_s5, %s918_s27  ;;  %p922_p8 = scmp.lt.u32.totalorder %s918_s27, %s1101_s5 }
 0x3be   :  { %p924_p9 = pnand %p922_p8, %p919_p7 }
 0x3c0   :  { %927 = shalt.err (!%p924_p9)
}
 0x3c1   :  { %s946_s7 = smov 128   ;;  %s947_s8 = smov 8  }
 0x3c2   :  { %656 = dma.vmem_to_hbm [thread:$0]  %s651_s4, 256, %s1101_s5, [#allocation4], %s946_s7, %s946_s7, %s947_s8  }
 0x3c3   :  { %932 = dma.done.wait [#allocation4], 256  }
 0x3c4   :  { %933 = vsyncadd [#allocation4], 4294967040 }
 0x3c5   :  { %660 = vsyncpa [#allocation3], 1 }
 0x3c6   :  { %661 = vsyncpa [#allocation6], 1 }
 0x3c7   :  { %662 = vsyncpa [#allocation4], 1 }

</bundles_post_ra>
